<compile_context>
chip_gen: v5e
topology: v5e:2x2
jax: 0.10.0
libtpu: 0.0.40
codegen_flags: <defaults>
</compile_context>

<pallas_src>
import functools
import math

import jax
import jax.numpy as jnp
from jax import lax
from jax.experimental import pallas as pl
from jax.experimental.pallas import tpu as pltpu


def _round_up(v, m):
    return (v + m - 1) // m * m


def _choose_batch_tile(batch, max_bt):
    """Lane-dense batch tile: multiple of 128 when batch is large, multiple of 8
    always; capped so the grid keeps >= 2 steps (v7x megacore) when possible."""
    if batch <= 128:
        return _round_up(batch, 8)
    bt = min(_round_up(max_bt, 128), _round_up(batch, 128))
    if pl.cdiv(batch, bt) < 2 and bt > 128:
        bt = max(128, _round_up(pl.cdiv(bt, 2), 128))
    return bt


def _mlp_kernel(x_ref, *refs, num_layers):
    """Fused MLP forward for one batch tile.

    refs = (w0, b0, w1, b1, ..., w_{L-1}, b_{L-1}, out_ref)
      * every w_i is torch layout (out_i, in_i); every b_i is (out_i, 1)
      * the last layer has out == 1
    x_ref:   (batch_tile, in_dim)  -- native input layout, no wrapper transpose
    out_ref: (1, batch_tile)       -- lane-dense output (batch on lanes)
    """
    out_ref = refs[-1]
    params = refs[:-1]

    # First layer: contract the in-dim of W0 against the in-dim of the x tile.
    # Result is (out0, bt): batch moves onto the lane axis with no explicit
    # transpose and no extra HBM traffic.
    h = lax.dot_general(
        params[0][...],            # (out0, in0)
        x_ref[...],                # (bt,   in0)
        dimension_numbers=(((1,), (1,)), ((), ())),
        preferred_element_type=jnp.float32,
    ) + params[1][...]             # (out0, 1) broadcasts over lanes

    # Remaining layers: ReLU (VPU) then MXU matmul with lane-dense N = bt.
    # The final layer (out == 1) goes through the same MXU path; its (1, bt)
    # result is still lane-dense, and no ReLU follows it.
    for li in range(1, num_layers):
        h = jnp.maximum(h, 0.0)
        w = params[2 * li][...]        # (out_i, in_i)
        b = params[2 * li + 1][...]    # (out_i, 1)
        h = jnp.dot(w, h, preferred_element_type=jnp.float32) + b

    out_ref[...] = h.astype(out_ref.dtype)


def my_regressor_forward(x, weights, biases, *, max_batch_tile=4096):
    """Run the fused MLP kernel.

    x:       (B, hidden_sizes[0]) float32, native (batch, features) layout
    weights: list of torch-layout (out_i, in_i) float32 arrays
    biases:  list of (out_i,) float32 arrays
    Returns (B, 1) float32, identical semantics to MyRegressor.forward.
    """
    B, in_dim = x.shape
    num_layers = len(weights)
    assert weights[0].shape[1] == in_dim, "first layer in_features must match x"
    assert weights[-1].shape[0] == 1, "output layer must have 1 output feature"

    bt = _choose_batch_tile(B, max_batch_tile)
    grid = pl.cdiv(B, bt)
    b_pad = grid * bt

    x = x.astype(jnp.float32)

    # Torch-layout weights; biases as (out, 1) columns (broadcast over lanes).
    flat_params = []
    for w, b in zip(weights, biases):
        flat_params.append(w.astype(jnp.float32))
        flat_params.append(b.astype(jnp.float32).reshape(-1, 1))

    # Parameters are tiny: keep them whole and VMEM-resident for the full grid.
    param_specs = [
        pl.BlockSpec(memory_space=pltpu.MemorySpace.VMEM) for _ in flat_params
    ]

    in_specs = [pl.BlockSpec((bt, in_dim), lambda i: (i, 0))] + param_specs
    out_spec = pl.BlockSpec((1, bt), lambda i: (0, i))

    kernel = functools.partial(_mlp_kernel, num_layers=num_layers)

    out_t = pl.pallas_call(
        kernel,
        out_shape=jax.ShapeDtypeStruct((1, b_pad), jnp.float32),
        grid_spec=pltpu.PrefetchScalarGridSpec(
            num_scalar_prefetch=0,
            grid=(grid,),
            in_specs=in_specs,
            out_specs=out_spec,
        ),
        compiler_params=pltpu.CompilerParams(
            dimension_semantics=("parallel",),
        ),
    )(x, *flat_params)

    # Back to PyTorch's (B, 1) convention; drop any padded batch columns.
    return out_t[:, :B].T


def init_params(hidden_sizes, key):
    """Deterministic init matching nn.Linear (torch layout, uniform +-1/sqrt(fan_in)).

    Layer dims: hidden_sizes[i] -> hidden_sizes[i+1] for the hidden stack,
    then hidden_sizes[-1] -> 1 for the output layer.
    """
    dims = list(zip(hidden_sizes[:-1], hidden_sizes[1:])) + [(hidden_sizes[-1], 1)]
    weights, biases = [], []
    for (fan_in, fan_out) in dims:
        key, kw, kb = jax.random.split(key, 3)
        bound = 1.0 / math.sqrt(fan_in)
        w = jax.random.uniform(kw, (fan_out, fan_in), jnp.float32, -bound, bound)
        b = jax.random.uniform(kb, (fan_out,), jnp.float32, -bound, bound)
        weights.append(w)
        biases.append(b)
    return weights, biases


def reference_forward(x, weights, biases):
    """Plain-JAX reference of the same forward pass (torch-layout weights)."""
    h = x
    for i, (w, b) in enumerate(zip(weights, biases)):
        h = h @ w.T + b
        if i < len(weights) - 1:
            h = jnp.maximum(h, 0.0)
    return h


if __name__ == "__main__":
    key = jax.random.PRNGKey(0)
    hidden_sizes = [16, 32, 32]   # input dim 16, two hidden layers of 32
    batch = 8

    key, kx, kp = jax.random.split(key, 3)
    x = jax.random.normal(kx, (batch, hidden_sizes[0]), jnp.float32)
    weights, biases = init_params(hidden_sizes, kp)

    out = my_regressor_forward(x, weights, biases)
    out = jax.block_until_ready(out)

    ref = reference_forward(x, weights, biases)
    assert out.shape == (batch, 1), out.shape
    assert jnp.allclose(out, ref, atol=1e-5, rtol=1e-5), (
        f"max abs err = {jnp.max(jnp.abs(out - ref))}"
    )
    print("KERNEL_OK")
</pallas_src>

<mosaic_0001>
module attributes {stable_mosaic.version = 11 : i64} {
  func.func @_mlp_kernel(%arg0: i32, %arg1: memref<8x16xf32, #tpu.memory_space<vmem>>, %arg2: memref<32x16xf32, #tpu.memory_space<vmem>>, %arg3: memref<32x1xf32, #tpu.memory_space<vmem>>, %arg4: memref<32x32xf32, #tpu.memory_space<vmem>>, %arg5: memref<32x1xf32, #tpu.memory_space<vmem>>, %arg6: memref<1x32xf32, #tpu.memory_space<vmem>>, %arg7: memref<1x1xf32, #tpu.memory_space<vmem>>, %arg8: memref<1x8xf32, #tpu.memory_space<vmem>>) attributes {dimension_semantics = [#tpu.dimension_semantics<parallel>], iteration_bounds = array<i64: 1>, scalar_prefetch = 0 : i64, scratch_operands = 0 : i64, tpu.core_type = #tpu.core_type<tc>, window_params = [{transform_indices = @transform_0, window_bounds = array<i64: 8, 16>}, {pipeline_mode = #tpu.pipeline_mode<synchronous>, transform_indices = @transform_1, window_bounds = array<i64: 32, 16>}, {pipeline_mode = #tpu.pipeline_mode<synchronous>, transform_indices = @transform_2, window_bounds = array<i64: 32, 1>}, {pipeline_mode = #tpu.pipeline_mode<synchronous>, transform_indices = @transform_3, window_bounds = array<i64: 32, 32>}, {pipeline_mode = #tpu.pipeline_mode<synchronous>, transform_indices = @transform_4, window_bounds = array<i64: 32, 1>}, {pipeline_mode = #tpu.pipeline_mode<synchronous>, transform_indices = @transform_5, window_bounds = array<i64: 1, 32>}, {pipeline_mode = #tpu.pipeline_mode<synchronous>, transform_indices = @transform_6, window_bounds = array<i64: 1, 1>}, {transform_indices = @transform_7, window_bounds = array<i64: 1, 8>}]} {
    %c0 = arith.constant 0 : index
    %c0_0 = arith.constant 0 : index
    %0 = vector.load %arg2[%c0, %c0_0] : memref<32x16xf32, #tpu.memory_space<vmem>>, vector<32x16xf32>
    %c0_1 = arith.constant 0 : index
    %c0_2 = arith.constant 0 : index
    %1 = vector.load %arg1[%c0_1, %c0_2] : memref<8x16xf32, #tpu.memory_space<vmem>>, vector<8x16xf32>
    %cst = arith.constant dense<0.000000e+00> : vector<32x8xf32>
    %2 = tpu.matmul %0, %1, %cst {dimension_numbers = #tpu.dot_dimension_numbers<[1], [1], [0], [0], [0, 0, 1, 0], [], []>} : vector<32x16xf32>, vector<8x16xf32>, vector<32x8xf32> -> vector<32x8xf32>
    %c0_3 = arith.constant 0 : index
    %c0_4 = arith.constant 0 : index
    %3 = vector.load %arg3[%c0_3, %c0_4] : memref<32x1xf32, #tpu.memory_space<vmem>>, vector<32x1xf32>
    %4 = vector.broadcast %3 : vector<32x1xf32> to vector<32x8xf32>
    %5 = arith.addf %2, %4 : vector<32x8xf32>
    %cst_5 = arith.constant 0.000000e+00 : f32
    %6 = vector.broadcast %cst_5 : f32 to vector<32x8xf32>
    %7 = arith.maximumf %5, %6 : vector<32x8xf32>
    %c0_6 = arith.constant 0 : index
    %c0_7 = arith.constant 0 : index
    %8 = vector.load %arg4[%c0_6, %c0_7] : memref<32x32xf32, #tpu.memory_space<vmem>>, vector<32x32xf32>
    %c0_8 = arith.constant 0 : index
    %c0_9 = arith.constant 0 : index
    %9 = vector.load %arg5[%c0_8, %c0_9] : memref<32x1xf32, #tpu.memory_space<vmem>>, vector<32x1xf32>
    %cst_10 = arith.constant dense<0.000000e+00> : vector<32x8xf32>
    %10 = tpu.matmul %8, %7, %cst_10 {dimension_numbers = #tpu.dot_dimension_numbers<[1], [0], [0], [1], [0, 0, 1, 1], [], []>} : vector<32x32xf32>, vector<32x8xf32>, vector<32x8xf32> -> vector<32x8xf32>
    %11 = vector.broadcast %9 : vector<32x1xf32> to vector<32x8xf32>
    %12 = arith.addf %10, %11 : vector<32x8xf32>
    %cst_11 = arith.constant 0.000000e+00 : f32
    %13 = vector.broadcast %cst_11 : f32 to vector<32x8xf32>
    %14 = arith.maximumf %12, %13 : vector<32x8xf32>
    %c0_12 = arith.constant 0 : index
    %c0_13 = arith.constant 0 : index
    %15 = vector.load %arg6[%c0_12, %c0_13] : memref<1x32xf32, #tpu.memory_space<vmem>>, vector<1x32xf32>
    %c0_14 = arith.constant 0 : index
    %c0_15 = arith.constant 0 : index
    %16 = vector.load %arg7[%c0_14, %c0_15] : memref<1x1xf32, #tpu.memory_space<vmem>>, vector<1x1xf32>
    %cst_16 = arith.constant dense<0.000000e+00> : vector<1x8xf32>
    %17 = tpu.matmul %15, %14, %cst_16 {dimension_numbers = #tpu.dot_dimension_numbers<[1], [0], [0], [1], [0, 0, 1, 1], [], []>} : vector<1x32xf32>, vector<32x8xf32>, vector<1x8xf32> -> vector<1x8xf32>
    %18 = vector.broadcast %16 : vector<1x1xf32> to vector<1x8xf32>
    %19 = arith.addf %17, %18 : vector<1x8xf32>
    %c0_17 = arith.constant 0 : index
    %c0_18 = arith.constant 0 : index
    %20 = vector.load %arg8[%c0_17, %c0_18] : memref<1x8xf32, #tpu.memory_space<vmem>>, vector<1x8xf32>
    tpu.vector_store %arg8[%c0_17, %c0_18], %19 {strides = array<i32>} : memref<1x8xf32, #tpu.memory_space<vmem>>, vector<1x8xf32>,
    return
  }
  func.func @transform_0(%arg0: i32) -> (i32, i32) {
    %c0_i32 = arith.constant 0 : i32
    %c0_i32_0 = arith.constant 0 : i32
    return %arg0, %c0_i32 : i32, i32
  }
  func.func @transform_1(%arg0: i32) -> (i32, i32) {
    %c0_i32 = arith.constant 0 : i32
    %c0_i32_0 = arith.constant 0 : i32
    %c0_i32_1 = arith.constant 0 : i32
    return %c0_i32, %c0_i32_0 : i32, i32
  }
  func.func @transform_2(%arg0: i32) -> (i32, i32) {
    %c0_i32 = arith.constant 0 : i32
    %c0_i32_0 = arith.constant 0 : i32
    %c0_i32_1 = arith.constant 0 : i32
    return %c0_i32, %c0_i32_0 : i32, i32
  }
  func.func @transform_3(%arg0: i32) -> (i32, i32) {
    %c0_i32 = arith.constant 0 : i32
    %c0_i32_0 = arith.constant 0 : i32
    %c0_i32_1 = arith.constant 0 : i32
    return %c0_i32, %c0_i32_0 : i32, i32
  }
  func.func @transform_4(%arg0: i32) -> (i32, i32) {
    %c0_i32 = arith.constant 0 : i32
    %c0_i32_0 = arith.constant 0 : i32
    %c0_i32_1 = arith.constant 0 : i32
    return %c0_i32, %c0_i32_0 : i32, i32
  }
  func.func @transform_5(%arg0: i32) -> (i32, i32) {
    %c0_i32 = arith.constant 0 : i32
    %c0_i32_0 = arith.constant 0 : i32
    %c0_i32_1 = arith.constant 0 : i32
    return %c0_i32, %c0_i32_0 : i32, i32
  }
  func.func @transform_6(%arg0: i32) -> (i32, i32) {
    %c0_i32 = arith.constant 0 : i32
    %c0_i32_0 = arith.constant 0 : i32
    %c0_i32_1 = arith.constant 0 : i32
    return %c0_i32, %c0_i32_0 : i32, i32
  }
  func.func @transform_7(%arg0: i32) -> (i32, i32) {
    %c0_i32 = arith.constant 0 : i32
    %c0_i32_0 = arith.constant 0 : i32
    return %c0_i32, %arg0 : i32, i32
  }
}

</mosaic_0001>

<bundles_post_ra>
// kernel: tpu_custom_call.1
= control target key start
LH: loop header
LB: loop body
LE: loop exit
PB: predicated region body
PF: predicated region fallthrough
CT: control target
= control target key end

     0   :  { %s393_s0 = inlined_call_operand.vmem [shape: f32[8,16], index: 0, kind: input, shape index: {}]   ;;  %s394_s1 = inlined_call_operand.vmem [shape: f32[32,16], index: 1, kind: input, shape index: {}]   ;;  %s395_s2 = inlined_call_operand.vmem [shape: f32[32,1], index: 2, kind: input, shape index: {}]   ;;  %s396_s3 = inlined_call_operand.vmem [shape: f32[32,32], index: 3, kind: input, shape index: {}]   ;;  %s397_s4 = inlined_call_operand.vmem [shape: f32[32,1], index: 4, kind: input, shape index: {}]   ;;  %s398_s5 = inlined_call_operand.vmem [shape: f32[1,32], index: 5, kind: input, shape index: {}]   ;;  %s399_s6 = inlined_call_operand.<no memory space> [shape: f32[1,1], index: 6, kind: input, shape index: {}]   ;;  %s400_s7 = inlined_call_operand.hbm [shape: f32[1,8], index: 7, kind: output, shape index: {}]  }
   0x1   :  { %v12_v0 = vstv %s399_s6 }
   0x2   :  { %13 = vst [vmem:[#allocation2] sm:$0x1] %v12_v0 }
   0x3   :  { %v33_v1 = vld [vmem:[%s393_s0] sm:$0xff]  ;;  %vm58_vm0 = vcmask 130048   ;;  %v37_v2 = vld [vmem:[%s395_s2 + $0x18] sm:$0xff]  ;;  %v280_v4 = vmov 0   ;;  %v35_v5 = vld [vmem:[%s395_s2 + $0x8] sm:$0xff] }
   0x4   :  { %230 = vmatpush.xpose.msk.msra.mxu0 %vm58_vm0, %v33_v1  ;;  %v29_v3 = vld [vmem:[%s394_s1] sm:$0xff]  ;;  %252 = vset.pattern.permute.xlu1 %v280_v4  ;;  %v32_v6 = vld [vmem:[%s394_s1 + $0x18] sm:$0xff] }
   0x5   :  { %251 = vset.pattern.permute.xlu0 %v280_v4  ;;  %45 = vperm.xlu1 %252, %v35_v5  }
   0x6   :  { %55 = vperm.xlu0 %251, %v37_v2   ;;  %240 = vmatpush.xpose.msk.msra.mxu1 %vm58_vm0, %v33_v1 }
   0x7   :  { %14 = vsyncpa [#allocation4], 0  ;;  %231 = vmatmul.msk.f32.vlgmr.msra.gmra.mxu0 %vm58_vm0, %v29_v3  ;;  %253 = vset.pattern.permute.xlu2 %v280_v4  ;;  %v34_v7 = vld [vmem:[%s395_s2] sm:$0xff]  ;;  %v36_v8 = vld [vmem:[%s395_s2 + $0x10] sm:$0xff]  ;;  %vm135_vm1 = vcmask 261120   ;;  %s281_s6 = smov [#allocation3]  }
   0x8   :  { %v30_v9 = vld [vmem:[%s394_s1 + $0x8] sm:$0xff]  ;;  %v111_v10 = vld [vmem:[%s397_s4] sm:$0xff]  ;;  %v31_v12 = vld [vmem:[%s394_s1 + $0x10] sm:$0xff]  ;;  %s219_s0 = sshll.u32 %s281_s6, 4  ;;  %s221_s12 = sshll.u32 %s400_s7, 4  ;;  %vm212_vm2 = vcmask 57344   ;;  %s220_s0 = int_to_ptr.vmem [resolvable:$true] %s219_s0  ;;  %s222_s12 = int_to_ptr.hbm [resolvable:$true] %s221_s12 }
   0x9   :  { %234 = vmatmul.msk.f32.vlgmr.msra.gmra.mxu1 %vm58_vm0, %v32_v6  ;;  %v112_v11 = vld [vmem:[%s397_s4 + $0x8] sm:$0xff]  ;;  %v114_v17 = vld [vmem:[%s397_s4 + $0x18] sm:$0xff]  ;;  %v113_v21 = vld [vmem:[%s397_s4 + $0x10] sm:$0xff] }
   0xa   :  { %132 = vperm.xlu2 %253, %v114_v17   ;;  %v182_v27 = vld [vmem:[#allocation2] sm:$0x1]  ;;  %v108_v33 = vld [vmem:[%s396_s3 + $0x8] sm:$0xff]  ;;  %v109_v34 = vld [vmem:[%s396_s3 + $0x10] sm:$0xff] }
   0xb   :  { %v107_v32 = vld [vmem:[%s396_s3] sm:$0xff]  ;;  %v110_v35 = vld [vmem:[%s396_s3 + $0x18] sm:$0xff] }
   0xc   :  { %v181_v52 = vld [vmem:[%s398_s5] sm:$0x1] }
   0xd   :  { %40 = vperm.xlu1 %252, %v34_v7  }
   0xe   :  { %50 = vperm.xlu0 %251, %v36_v8  }
   0xf   :  { %232 = vmatmul.msk.f32.gmra.mxu0 %vm58_vm0, %v30_v9 }
  0x12   :  { %127 = vperm.xlu2 %253, %v113_v21  }
  0x15   :  { %117 = vperm.xlu1 %252, %v111_v10  }
  0x16   :  { %122 = vperm.xlu0 %251, %v112_v11  }
  0x17   :  { %233 = vmatmul.msk.f32.gmra.mxu0 %vm58_vm0, %v31_v12 }
  0x1a   :  { %185 = vperm.xlu2 %253, %v182_v27  }
  0x64   :  { %v133_v36 = vpop.permute.xlu2 %132 }
  0x6c   :  { %v128_v38 = vpop.permute.xlu2 %127 }
  0x74   :  { %v186_v53 = vpop.permute.xlu2 %185 }
  0x75   :  { %v188_v54 = vperm.slane %v186_v53, 0 }
  0x77   :  { %v46_v18 = vpop.permute.xlu1 %45 }
  0x78   :  { %v56_v14 = vpop.permute.xlu0 %55 }
  0x7f   :  { %v41_v22 = vpop.permute.xlu1 %40 }
  0x80   :  { %v51_v23 = vpop.permute.xlu0 %50 }
  0x84   :  { %v91_v13 = vpop.f32.mrf.mxu0 }
  0x85   :  { %v92_v28 = vadd.f32 %v91_v13, %v41_v22 }
  0x86   :  { %v100_v15 = vpop.f32.mrf.mxu1 }
  0x87   :  { %v101_v16 = vadd.f32 %v100_v15, %v56_v14  ;;  %v103_v31 = vmax.f32 %v92_v28, 0.0  ;;  %v118_v47 = vpop.permute.xlu1 %117 }
  0x88   :  { %v123_v43 = vpop.permute.xlu0 %122 }
  0x89   :  { %v106_v19 = vmax.f32 %v101_v16, 0.0 }
  0x8b   :  { %160 = vmatpush.msrb.mxu1 %v106_v19  ;;  %241 = vmatpush.msra.mxu2 %v106_v19 }
  0x8c   :  { %v94_v20 = vpop.f32.mrf.mxu0  ;;  %242 = vmatpush.msra.mxu3 %v106_v19 }
  0x8d   :  { %v95_v25 = vadd.f32 %v94_v20, %v46_v18 }
  0x8f   :  { %v104_v30 = vmax.f32 %v95_v25, 0.0 }
  0x94   :  { %v97_v24 = vpop.f32.mrf.mxu0 }
  0x95   :  { %v98_v26 = vadd.f32 %v97_v24, %v51_v23 }
  0x97   :  { %v105_v29 = vmax.f32 %v98_v26, 0.0 }
  0x99   :  { %161 = vmatpush.msrb.mxu1 %v105_v29  ;;  %243 = vmatpush.msra.mxu2 %v105_v29 }
  0x9a   :  { %244 = vmatpush.msra.mxu3 %v105_v29 }
  0x9b   :  { %162 = vmatpush.msrb.mxu1 %v104_v30  ;;  %245 = vmatpush.msra.mxu2 %v104_v30 }
  0x9c   :  { %246 = vmatpush.msra.mxu3 %v104_v30 }
  0x9d   :  { %163 = vmatpush.msrb.mxu1 %v103_v31  ;;  %247 = vmatpush.msra.mxu2 %v103_v31 }
  0x9e   :  { %248 = vmatpush.msra.mxu3 %v103_v31  ;;  %235 = vmatmul.msk.f32.vlgmr.msrb.gmra.mxu1 %vm135_vm1, %v107_v32 }
  0x9f   :  { %236 = vmatmul.msk.f32.vlgmr.msra.gmra.mxu2 %vm135_vm1, %v108_v33  ;;  %237 = vmatmul.msk.f32.vlgmr.msra.gmra.mxu3 %vm135_vm1, %v109_v34 }
  0xa7   :  { %238 = vmatmul.msk.f32.gmra.mxu3 %vm135_vm1, %v110_v35 }
 0x11b   :  { %v165_v44 = vpop.f32.mrf.mxu1 }
 0x11c   :  { %v166_v48 = vadd.f32 %v165_v44, %v118_v47 }
 0x11e   :  { %v177_v51 = vmax.f32 %v166_v48, 0.0 }
 0x122   :  { %v171_v37 = vpop.f32.mrf.mxu3  ;;  %v168_v39 = vpop.f32.mrf.mxu2 }
 0x123   :  { %v172_v41 = vadd.f32 %v171_v37, %v128_v38  ;;  %v169_v45 = vadd.f32 %v168_v39, %v123_v43 }
 0x125   :  { %v179_v49 = vmax.f32 %v172_v41, 0.0  ;;  %v178_v50 = vmax.f32 %v169_v45, 0.0 }
 0x12a   :  { %v174_v40 = vpop.f32.mrf.mxu3 }
 0x12b   :  { %v175_v42 = vadd.f32 %v174_v40, %v133_v36 }
 0x12d   :  { %v180_v46 = vmax.f32 %v175_v42, 0.0 }
 0x12f   :  { %204 = vmatpush.msrb.mxu2 %v180_v46 }
 0x131   :  { %205 = vmatpush.msrb.mxu2 %v179_v49 }
 0x133   :  { %206 = vmatpush.msrb.mxu2 %v178_v50 }
 0x135   :  { %207 = vmatpush.msrb.mxu2 %v177_v51 }
 0x136   :  { %239 = vmatmul.msk.f32.vlgmr.msrb.gmra.mxu2 %vm135_vm1, %v181_v52 }
 0x1b9   :  { %v209_v55 = vpop.f32.mrf.mxu2 }
 0x1ba   :  { %v210_v56 = vadd.f32 %v209_v55, %v188_v54 }
 0x1bc   :  { %213 = vst.msk [vmem:[#allocation3] sm:$0x1] %vm212_vm2, %v210_v56 }
 0x1bd   :  { %224 = dma.vmem_to_hbm [thread:$0]  %s220_s0, 16, %s222_s12, [#allocation4]  }
 0x1be   :  { %278 = dma.done.wait [#allocation4], 16  }
 0x1bf   :  { %279 = vsyncadd [#allocation4], 4294967280 }
 0x1c0   :  { %229 = vsyncpa [#allocation4], 1 }

</bundles_post_ra>
